<compile_context>
chip_gen: v7x
topology: tpu7x:2x2x1
jax: 0.10.0
libtpu: 0.0.40
codegen_flags: <defaults>
</compile_context>

<pallas_src>
import jax
import jax.numpy as jnp
from jax.experimental import pallas as pl
from jax.experimental.pallas import tpu as pltpu


# -----------------------------------------------------------------------------
# Tiling helper: pad the lane (row-count) axis to a multiple of 128 and pick a
# column tile that divides the padded extent (no over-padding).  Prefer >=2 grid
# steps so the "parallel" axis can shard across v7x's two TensorCores.
# -----------------------------------------------------------------------------
_MAX_COL_TILE = 2048


def _round_up(x, m):
    return (x + m - 1) // m * m


def _pick_col_tiling(n):
    n_pad = _round_up(n, 128)
    cap = min(_MAX_COL_TILE, n_pad)
    divisors = [t for t in range(128, cap + 1, 128) if n_pad % t == 0]
    multi = [t for t in divisors if n_pad // t >= 2]
    tile = max(multi) if multi else max(divisors)
    return n_pad, tile


# -----------------------------------------------------------------------------
# Kernel 1: fused modality-average + 1x1-conv input projection
#   out[D, N] = (0.5*[W|W])[D, 2C] @ stacked[2C, N] + b[D, 1]
#             = W @ ((src + src_ir) / 2) + b
# -----------------------------------------------------------------------------
def _avg_proj_kernel(x_ref, w_ref, b_ref, out_ref):
    out_ref[...] = (
        jnp.dot(w_ref[...], x_ref[...], preferred_element_type=jnp.float32)
        + b_ref[...]
    )


def avg_input_proj(stacked_t, w2, b, *, col_tile):
    # stacked_t: [2C, Npad] bf16   w2: [D, 2C] bf16   b: [D, 1] f32  ->  [D, Npad] f32
    k, n = stacked_t.shape
    d = w2.shape[0]
    cost = pl.CostEstimate(
        flops=int(2 * d * k * n),
        transcendentals=0,
        bytes_accessed=int(k * n * 2 + d * k * 2 + d * 4 + d * n * 4),
    )
    return pl.pallas_call(
        _avg_proj_kernel,
        out_shape=jax.ShapeDtypeStruct((d, n), jnp.float32),
        grid=(n // col_tile,),
        in_specs=[
            pl.BlockSpec((k, col_tile), lambda i: (0, i)),
            pl.BlockSpec((d, k), lambda i: (0, 0)),      # weights VMEM-resident
            pl.BlockSpec((d, 1), lambda i: (0, 0)),
        ],
        out_specs=pl.BlockSpec((d, col_tile), lambda i: (0, i)),
        compiler_params=pltpu.CompilerParams(dimension_semantics=("parallel",)),
        cost_estimate=cost,
    )(stacked_t, w2, b)


# -----------------------------------------------------------------------------
# Kernel 2: fused prediction heads on the decoder output hs (transposed layout)
#   fused[8+D, N] = [Wc_pad ; W1] @ hs + [bc_pad ; b1]
#   logits        = fused[0:ncls]
#   h1            = relu(fused[8:])
#   boxes         = sigmoid(W3 @ relu(W2 @ h1 + b2) + b3)
# -----------------------------------------------------------------------------
def _make_heads_kernel(ncls):
    def kernel(hs_ref, wc1_ref, bc1_ref, w2_ref, b2_ref, w3_ref, b3_ref,
               logits_ref, boxes_ref):
        hs = hs_ref[...]                                           # [D, T] bf16
        fused = (
            jnp.dot(wc1_ref[...], hs, preferred_element_type=jnp.float32)
            + bc1_ref[...]
        )                                                          # [8+D, T] f32
        logits_ref[...] = fused[:ncls, :]
        h = jnp.maximum(fused[8:, :], 0.0)                         # [D, T] f32
        h = jnp.maximum(
            jnp.dot(w2_ref[...], h.astype(jnp.bfloat16),
                    preferred_element_type=jnp.float32) + b2_ref[...], 0.0)
        boxes = (
            jnp.dot(w3_ref[...], h.astype(jnp.bfloat16),
                    preferred_element_type=jnp.float32) + b3_ref[...]
        )
        boxes_ref[...] = jax.nn.sigmoid(boxes)                     # f32 sigmoid
    return kernel


def prediction_heads(hs_t, wc1, bc1, w2, b2, w3, b3, *, ncls, col_tile):
    # hs_t: [D, N] bf16 ; wc1: [8+D, D] bf16 ; other weights [out, in] bf16 ;
    # biases [out, 1] f32.  col_tile may equal N (full-array block, no 128-padding).
    d, n = hs_t.shape
    dpc = wc1.shape[0]
    full = lambda a: pl.BlockSpec(a.shape, lambda i: (0,) * a.ndim)
    cost = pl.CostEstimate(
        flops=int(2 * n * (dpc * d + d * d + 4 * d)),
        transcendentals=int(8 * n),
        bytes_accessed=int(d * n * 2 + (dpc * d + d * d + 4 * d) * 2
                           + (dpc + d + 4) * 4 + (ncls + 4) * n * 4),
    )
    return pl.pallas_call(
        _make_heads_kernel(ncls),
        out_shape=(
            jax.ShapeDtypeStruct((ncls, n), jnp.float32),
            jax.ShapeDtypeStruct((4, n), jnp.float32),
        ),
        grid=(n // col_tile,),
        in_specs=[pl.BlockSpec((d, col_tile), lambda i: (0, i)),
                  full(wc1), full(bc1), full(w2), full(b2), full(w3), full(b3)],
        out_specs=(
            pl.BlockSpec((ncls, col_tile), lambda i: (0, i)),
            pl.BlockSpec((4, col_tile), lambda i: (0, i)),
        ),
        compiler_params=pltpu.CompilerParams(dimension_semantics=("parallel",)),
        cost_estimate=cost,
    )(hs_t, wc1, bc1, w2, b2, w3, b3)


# -----------------------------------------------------------------------------
# One-time parameter preparation (hoisted out of the forward pass).
# -----------------------------------------------------------------------------
def prepare_params(params):
    d, c = params["w_proj"].shape
    ncls = params["wc"].shape[0]
    # Fold the 0.5 modality average into the projection weight: [D, 2C]
    w_proj2 = 0.5 * jnp.concatenate([params["w_proj"], params["w_proj"]], axis=1)
    # Fuse class head with bbox-MLP layer 1: pad Wc to 8 rows (sublane boundary).
    wc_pad = jnp.zeros((8, d), params["wc"].dtype).at[:ncls].set(params["wc"])
    bc_pad = jnp.zeros((8,), params["bc"].dtype).at[:ncls].set(params["bc"])
    prep = {
        "w_proj2": w_proj2.astype(jnp.bfloat16),
        "b_proj": params["b_proj"].reshape(-1, 1).astype(jnp.float32),
        "wc1": jnp.concatenate([wc_pad, params["w1"]], axis=0).astype(jnp.bfloat16),
        "bc1": jnp.concatenate([bc_pad, params["b1"]], axis=0)
                  .reshape(-1, 1).astype(jnp.float32),
        "w2": params["w2"].astype(jnp.bfloat16),
        "b2": params["b2"].reshape(-1, 1).astype(jnp.float32),
        "w3": params["w3"].astype(jnp.bfloat16),
        "b3": params["b3"].reshape(-1, 1).astype(jnp.float32),
        # pass-through for the injected-dependency stubs
        "w_bb": params["w_bb"],
        "query_embed": params["query_embed"],
        "pos": params["pos"],
    }
    return prep, ncls, d


# -----------------------------------------------------------------------------
# Injected-dependency stubs (plain JAX, deterministic).
# -----------------------------------------------------------------------------
def backbone_stub(img, w_bb):
    # TODO(synk): backbone is an injected dependency (e.g. ResNet); stubbed with a
    # stride-2 average pool + fixed 1x1 channel projection in plain JAX.
    b, c, h, w = img.shape
    f = img.reshape(b, c, h // 2, 2, w // 2, 2).mean(axis=(3, 5))      # [B,3,Hf,Wf]
    feat = jnp.einsum("bchw,cd->bdhw", f, w_bb)                         # [B,Cf,Hf,Wf]
    mask = jnp.zeros((b, h // 2, w // 2), dtype=bool)                   # no padding
    return feat, mask


def transformer_stub(memory, mask, query_embed, pos, num_layers=3):
    # TODO(synk): DETR encoder/decoder is an injected dependency; stubbed with one
    # deterministic cross-attention per decoder layer in plain JAX.
    b, s, d = memory.shape
    k = memory + pos
    tgt = jnp.broadcast_to(query_embed[None], (b, query_embed.shape[0], d))
    hs = []
    for _ in range(num_layers):
        logits = jnp.einsum("bqd,bsd->bqs", tgt, k) / jnp.sqrt(d)
        logits = jnp.where(mask[:, None, :], -1e9, logits)
        attn = jax.nn.softmax(logits, axis=-1)
        tgt = tgt + jnp.einsum("bqs,bsd->bqd", attn, memory)
        hs.append(tgt)
    return jnp.stack(hs, axis=0)                                        # [L,B,Q,D]


# -----------------------------------------------------------------------------
# avg_baseline forward
# -----------------------------------------------------------------------------
def avg_baseline_forward(prep, ncls, d, img_rgb, img_ir):
    # backbone on both modalities (same backbone instance, as in the PyTorch module)
    feat, mask = backbone_stub(img_rgb, prep["w_bb"])
    feat_ir, _ = backbone_stub(img_ir, prep["w_bb"])

    b, c, hf, wf = feat.shape
    hw = hf * wf
    n = b * hw

    # stack modalities on the channel (sublane) axis, flattened (batch, spatial) on lanes:
    # [2C, B*HW] built with one concat + transpose + reshape.
    stacked = (
        jnp.concatenate([feat, feat_ir], axis=1)
        .reshape(b, 2 * c, hw).transpose(1, 0, 2).reshape(2 * c, n)
    )

    n_pad, col_tile = _pick_col_tiling(n)
    if n_pad > n:
        stacked = jnp.pad(stacked, ((0, 0), (0, n_pad - n)))

    # fused: averaged_features = (src + src_ir)/2 ; memory = input_proj(averaged_features)
    proj_t = avg_input_proj(
        stacked.astype(jnp.bfloat16), prep["w_proj2"], prep["b_proj"],
        col_tile=col_tile,
    )                                                                   # [D, n_pad] f32
    memory = proj_t[:, :n].reshape(d, b, hw).transpose(1, 2, 0)         # [B, HW, D]

    pos_flat = jnp.transpose(prep["pos"], (0, 2, 3, 1)).reshape(b, hw, d)
    mask_flat = mask.reshape(b, hw)
    assert mask_flat is not None

    hs = transformer_stub(memory, mask_flat, prep["query_embed"], pos_flat)  # [L,B,Q,D]
    l, _, q, _ = hs.shape
    nq = l * b * q
    hs_t = hs.reshape(nq, d).T                                          # [D, nq]

    if nq < 128:
        # small decoder output: full-array block, no 128-padding, single grid step
        q_tile, nq_pad = nq, nq
    else:
        nq_pad, q_tile = _pick_col_tiling(nq)
        if nq_pad > nq:
            hs_t = jnp.pad(hs_t, ((0, 0), (0, nq_pad - nq)))

    logits_t, boxes_t = prediction_heads(
        hs_t.astype(jnp.bfloat16),
        prep["wc1"], prep["bc1"], prep["w2"], prep["b2"], prep["w3"], prep["b3"],
        ncls=ncls, col_tile=q_tile,
    )

    outputs_class = logits_t[:, :nq].T.reshape(l, b, q, ncls)
    outputs_coord = boxes_t[:, :nq].T.reshape(l, b, q, 4)

    out = {
        "pred_logits": outputs_class[-1],
        "pred_boxes": outputs_coord[-1],
        "auxiliary_test": (1, 1),
    }
    return out


# -----------------------------------------------------------------------------
# main
# -----------------------------------------------------------------------------
if __name__ == "__main__":
    key = jax.random.PRNGKey(0)
    ks = jax.random.split(key, 16)

    # small, module-consistent shapes
    B, H, W = 2, 16, 16          # input images: [B, 3, 16, 16] per modality
    C_FEAT = 8                   # backbone.num_channels
    D = 32                       # transformer.d_model (hidden_dim)
    NUM_QUERIES = 8
    NUM_CLASSES = 5              # class_embed -> num_classes + 1 = 6
    HF, WF = H // 2, W // 2      # backbone feature map 8x8

    params = {
        "w_bb":   0.1 * jax.random.normal(ks[0], (3, C_FEAT), jnp.float32),
        # input_proj: Conv2d(C_FEAT, D, kernel_size=1)  -> weight [D, C], bias [D]
        "w_proj": 0.1 * jax.random.normal(ks[1], (D, C_FEAT), jnp.float32),
        "b_proj": 0.1 * jax.random.normal(ks[2], (D,), jnp.float32),
        "query_embed": 0.1 * jax.random.normal(ks[3], (NUM_QUERIES, D), jnp.float32),
        "pos":    0.1 * jax.random.normal(ks[4], (B, D, HF, WF), jnp.float32),
        # class_embed: Linear(D, NUM_CLASSES + 1)  -> weight [out, in], bias [out]
        "wc": 0.1 * jax.random.normal(ks[5], (NUM_CLASSES + 1, D), jnp.float32),
        "bc": 0.1 * jax.random.normal(ks[6], (NUM_CLASSES + 1,), jnp.float32),
        # bbox_embed: MLP(D, D, 4, num_layers=3)
        "w1": 0.1 * jax.random.normal(ks[7], (D, D), jnp.float32),
        "b1": 0.1 * jax.random.normal(ks[8], (D,), jnp.float32),
        "w2": 0.1 * jax.random.normal(ks[9], (D, D), jnp.float32),
        "b2": 0.1 * jax.random.normal(ks[10], (D,), jnp.float32),
        "w3": 0.1 * jax.random.normal(ks[11], (4, D), jnp.float32),
        "b3": 0.1 * jax.random.normal(ks[12], (4,), jnp.float32),
    }

    img_rgb = jax.random.normal(ks[13], (B, 3, H, W), jnp.float32)
    img_ir = jax.random.normal(ks[14], (B, 3, H, W), jnp.float32)

    prep, ncls, d_model = prepare_params(params)     # one-time param prep (hoisted)
    out = avg_baseline_forward(prep, ncls, d_model, img_rgb, img_ir)
    jax.block_until_ready(out["pred_logits"])
    jax.block_until_ready(out["pred_boxes"])

    assert out["pred_logits"].shape == (B, NUM_QUERIES, NUM_CLASSES + 1)
    assert out["pred_boxes"].shape == (B, NUM_QUERIES, 4)
    assert bool(jnp.all((out["pred_boxes"] >= 0.0) & (out["pred_boxes"] <= 1.0)))
    assert out["auxiliary_test"] == (1, 1)

    print("KERNEL_OK")
</pallas_src>

<mosaic_0001>
module attributes {stable_mosaic.version = 11 : i64} {
  func.func @_avg_proj_kernel(%arg0: i32, %arg1: memref<16x128xbf16, #tpu.memory_space<vmem>>, %arg2: memref<32x16xbf16, #tpu.memory_space<vmem>>, %arg3: memref<32x1xf32, #tpu.memory_space<vmem>>, %arg4: memref<32x128xf32, #tpu.memory_space<vmem>>) attributes {dimension_semantics = [#tpu.dimension_semantics<parallel>], iteration_bounds = array<i64: 1>, scalar_prefetch = 0 : i64, scratch_operands = 0 : i64, tpu.core_type = #tpu.core_type<tc>, window_params = [{transform_indices = @transform_0, window_bounds = array<i64: 16, 128>}, {pipeline_mode = #tpu.pipeline_mode<synchronous>, transform_indices = @transform_1, window_bounds = array<i64: 32, 16>}, {pipeline_mode = #tpu.pipeline_mode<synchronous>, transform_indices = @transform_2, window_bounds = array<i64: 32, 1>}, {transform_indices = @transform_3, window_bounds = array<i64: 32, 128>}]} {
    %c0 = arith.constant 0 : index
    %c0_0 = arith.constant 0 : index
    %0 = vector.load %arg2[%c0, %c0_0] : memref<32x16xbf16, #tpu.memory_space<vmem>>, vector<32x16xbf16>
    %c0_1 = arith.constant 0 : index
    %c0_2 = arith.constant 0 : index
    %1 = vector.load %arg1[%c0_1, %c0_2] : memref<16x128xbf16, #tpu.memory_space<vmem>>, vector<16x128xbf16>
    %cst = arith.constant dense<0.000000e+00> : vector<32x128xf32>
    %2 = tpu.matmul %0, %1, %cst {dimension_numbers = #tpu.dot_dimension_numbers<[1], [0], [0], [1], [0, 0, 1, 1], [], []>} : vector<32x16xbf16>, vector<16x128xbf16>, vector<32x128xf32> -> vector<32x128xf32>
    %c0_3 = arith.constant 0 : index
    %c0_4 = arith.constant 0 : index
    %3 = vector.load %arg3[%c0_3, %c0_4] : memref<32x1xf32, #tpu.memory_space<vmem>>, vector<32x1xf32>
    %4 = vector.broadcast %3 : vector<32x1xf32> to vector<32x128xf32>
    %5 = arith.addf %2, %4 : vector<32x128xf32>
    %c0_5 = arith.constant 0 : index
    %c0_6 = arith.constant 0 : index
    %6 = vector.load %arg4[%c0_5, %c0_6] : memref<32x128xf32, #tpu.memory_space<vmem>>, vector<32x128xf32>
    tpu.vector_store %arg4[%c0_5, %c0_6], %5 {strides = array<i32>} : memref<32x128xf32, #tpu.memory_space<vmem>>, vector<32x128xf32>,
    return
  }
  func.func @transform_0(%arg0: i32) -> (i32, i32) {
    %c0_i32 = arith.constant 0 : i32
    %c0_i32_0 = arith.constant 0 : i32
    return %c0_i32, %arg0 : i32, i32
  }
  func.func @transform_1(%arg0: i32) -> (i32, i32) {
    %c0_i32 = arith.constant 0 : i32
    %c0_i32_0 = arith.constant 0 : i32
    %c0_i32_1 = arith.constant 0 : i32
    return %c0_i32, %c0_i32_0 : i32, i32
  }
  func.func @transform_2(%arg0: i32) -> (i32, i32) {
    %c0_i32 = arith.constant 0 : i32
    %c0_i32_0 = arith.constant 0 : i32
    %c0_i32_1 = arith.constant 0 : i32
    return %c0_i32, %c0_i32_0 : i32, i32
  }
  func.func @transform_3(%arg0: i32) -> (i32, i32) {
    %c0_i32 = arith.constant 0 : i32
    %c0_i32_0 = arith.constant 0 : i32
    return %c0_i32, %arg0 : i32, i32
  }
}

</mosaic_0001>

<bundles_post_ra>
// kernel: tpu_custom_call.1
= control target key start
LH: loop header
LB: loop body
LE: loop exit
PB: predicated region body
PF: predicated region fallthrough
CT: control target
= control target key end

     0   :  { %vm62_vm0 = vcmask 130048   ;;  %v185_v3 = vmov 0   ;;  %s242_s0 = inlined_call_operand.vmem [shape: bf16[16,128], index: 0, kind: input, shape index: {}]   ;;  %s243_s1 = inlined_call_operand.vmem [shape: bf16[32,16], index: 1, kind: input, shape index: {}]   ;;  %s244_s2 = inlined_call_operand.vmem [shape: f32[32,1], index: 2, kind: input, shape index: {}]   ;;  %s245_s3 = inlined_call_operand.hbm [shape: f32[32,128], index: 3, kind: output, shape index: {}]  }
   0x1   :  { %v158_v0 = vld [vmem:[%s242_s0] sm:$0xff]   ;;  %v160_v2 = vld [vmem:[%s243_s1 + $0x8] sm:$0xff]   ;;  %157 = vset.pattern.permute.xlu1 %v185_v3  ;;  %v24_v4 = vld [vmem:[%s244_s2 + $0x10] sm:$0xff]  ;;  %156 = vset.pattern.permute.xlu0 %v185_v3 }
   0x2   :  { %v159_v1 = vld [vmem:[%s243_s1] sm:$0xff]   ;;  %146 = vmatprep.subr.bf16.mxu0 %v158_v0  ;;  %38 = vperm.xlu1 %157, %v24_v4  }
   0x3   :  { %147 = vmatpush3.bf16.msra.mxu0 %v158_v0  ;;  %148 = vmatprep.mubr.msk.bf16.mxu0 %vm62_vm0, %v159_v1  ;;  %v22_v5 = vld [vmem:[%s244_s2] sm:$0xff] }
   0x4   :  { %8 = vsyncpa [#allocation3], 0  ;;  %28 = vperm.xlu0 %156, %v22_v5   ;;  %v25_v6 = vld [vmem:[%s244_s2 + $0x18] sm:$0xff]  ;;  %v23_v7 = vld [vmem:[%s244_s2 + $0x8] sm:$0xff]  ;;  %s186_s24 = smov [#allocation2]  }
   0x5   :  { %s127_s25 = sshll.u32 %s186_s24, 4  ;;  %s128_s25 = int_to_ptr.vmem [resolvable:$true] %s127_s25 }
   0x6   :  { %149 = vmatmul.mubr.msk.bf16.vlgmr.msra.gmra.mrb[0].mxu0 %vm62_vm0, %v160_v2  ;;  %43 = vperm.xlu1 %157, %v25_v6   ;;  %s161_s2 = scalar_lea.vmem %s128_s25, 512  ;;  %p166_p1 = scmp.lt.s32.totalorder %s128_s25, %s128_s25 }
   0x7   :  { %p162_p0 = scmp.ne.s32.totalorder %s128_s25, %s161_s2  ;;  %p167_p2 = scmp.lt.s32.totalorder %s161_s2, %s161_s2 }
   0x8   :  { %33 = vperm.xlu0 %156, %v23_v7  }
   0x9   :  { %p168_p3 = por %p167_p2, %p166_p1 }
   0xb   :  { %p169_p4 = pnand %p168_p3, %p162_p0 }
  0x81   :  { %v39_v8 = vpop.permute.xlu1 %38 }
  0x83   :  { %v29_v9 = vpop.permute.xlu0 %28 }
  0x85   :  { %v44_v13 = vpop.permute.xlu1 %43 }
  0x87   :  { %v34_v16 = vpop.permute.xlu0 %33 }
  0xd9   :  { %v150_v10 = vpop.f32.mrb[0].mxu0 }
  0xda   :  { %v112_v11 = vadd.f32 %v150_v10, %v39_v8  ;;  %v103_v12 = vpop.f32.mrb[1].mxu0 }
  0xdb   :  { %v104_v14 = vadd.f32 %v103_v12, %v29_v9  ;;  %v151_v15 = vpop.f32.mrb[2].mxu0 }
  0xdc   :  { %120 = vst [vmem:[#allocation2 + $0x10] sm:$0xff] %v112_v11  ;;  %v115_v17 = vadd.f32 %v151_v15, %v44_v13  ;;  %v106_v18 = vpop.f32.mrb[3].mxu0 }
  0xdd   :  { %118 = vst [vmem:[#allocation2] sm:$0xff] %v104_v14  ;;  %v107_v19 = vadd.f32 %v106_v18, %v34_v16 }
  0xde   :  { %121 = vst [vmem:[#allocation2 + $0x18] sm:$0xff] %v115_v17 }
  0xdf   :  { %119 = vst [vmem:[#allocation2 + $0x8] sm:$0xff] %v107_v19 }
  0xe0   :  { %172 = shalt.err (!%p169_p4)
}
  0xe1   :  { %s173_s28 = scalar_lea.hbm %s245_s3, 512 }
  0xe2   :  { %p174_p5 = scmp.ne.s32.totalorder %s245_s3, %s173_s28  ;;  %p177_p6 = scmp.lt.u32.totalorder %s173_s28, %s245_s3 }
  0xe4   :  { %p179_p7 = pnand %p177_p6, %p174_p5 }
  0xe6   :  { %182 = shalt.err (!%p179_p7)
}
  0xe7   :  { %s187_s6 = smov 128   ;;  %s188_s7 = smov 8  }
  0xe8   :  { %133 = dma.vmem_to_hbm [thread:$0]  %s128_s25, 512, %s245_s3, [#allocation3], %s187_s6, %s187_s6, %s188_s7  }
  0xe9   :  { %183 = dma.done.wait [#allocation3], 512  }
  0xea   :  { %184 = vsyncadd [#allocation3], 4294966784 }
  0xeb   :  { %137 = vsyncpa [#allocation3], 1 }

</bundles_post_ra>
